<compile_context>
chip_gen: v6e
topology: v6e:2x2x1
jax: 0.10.0
libtpu: 0.0.40
codegen_flags: <defaults>
</compile_context>

<pallas_src>
import jax
import jax.numpy as jnp
from jax.experimental import pallas as pl
from jax.experimental.pallas import tpu as pltpu

# ---- problem sizes (small, consistent with the module) ----------------------
N, C_IN, C_OUT, T, V = 2, 4, 16, 8, 16
KT = 3                      # kernel_size[0] (temporal), odd
PAD = (KT - 1) // 2
TV = T * V                  # 128 lanes
C_TOT = N * C_OUT           # 32 sublane rows in the output slab
EPS = 1e-5


def st_gcn_kernel(x1_ref, a_ref, w1_ref, wt_ref, h1_ref, pa_ref, out_ref):
    """Single invocation; the whole (tiny) batch sits on sublanes.

    x1_ref : (N*C_IN+1, T*V)        input with ones row (bias fold), f32
    a_ref  : (T*V, T*V)             per-sample block-diagonal adjacency
    w1_ref : (2*N*C_OUT, N*C_IN+1)  fused gcn+residual 1x1 weights (+bias column)
    wt_ref : (KT, N*C_OUT, N*C_OUT) temporal-tap weights, kron(I_N, s2*wt[k])
    h1_ref : (N*C_OUT, 1)           BN1 shift (added after the adjacency matmul)
    pa_ref : (2,) SMEM              [PReLU_tcn alpha, PReLU_final alpha]
    out_ref: (N*C_OUT, T*V)         lane-dense output slab
    """
    a_tcn = pa_ref[0]
    a_fin = pa_ref[1]

    a_blk = a_ref[...]                     # (128, 128)
    cdt = a_blk.dtype                      # f32, or bf16 if the caller opted in

    # fused gcn + residual 1x1 convs (+biases): ONE (64,9)x(9,128) MXU matmul
    yr = jnp.dot(w1_ref[...], x1_ref[...], preferred_element_type=jnp.float32)
    y = yr[:C_TOT, :]                      # gcn branch (bg folded)        (32,128)
    r = yr[C_TOT:, :]                      # residual branch (br+bt folded)(32,128)

    # graph matmul: block-diagonal adjacency => one K=128 MXU pass; + BN1 shift
    z = jnp.dot(y.astype(cdt), a_blk, preferred_element_type=jnp.float32) + h1_ref[...]
    h = jnp.where(z >= 0.0, z, a_tcn * z)  # PReLU (tcn head)

    # temporal (KT,1) conv: KT lane-shifted taps accumulated (no smat concat copy).
    # Lane index IS t*V + v after the layout change (no modulo needed).
    lane = jax.lax.broadcasted_iota(jnp.int32, (C_TOT, TV), 1)
    u = jnp.zeros((C_TOT, TV), jnp.float32)
    for k in range(KT):                    # static unroll, KT = 3
        s = (PAD - k) * V                  # tap k reads h at time (t + k - PAD)
        if s == 0:
            tap = h
        elif s > 0:                        # earlier time: zero the first s lanes
            tap = jnp.where(lane >= s, pltpu.roll(h, shift=s, axis=1), 0.0)
        else:                              # later time: zero the last |s| lanes
            tap = jnp.where(lane < TV + s, pltpu.roll(h, shift=TV + s, axis=1), 0.0)
        u = u + jnp.dot(wt_ref[k], tap.astype(cdt), preferred_element_type=jnp.float32)

    o = u + r
    out_ref[...] = jnp.where(o >= 0.0, o, a_fin * o)   # final PReLU


def prepare_st_gcn_params(A, wg, bg, wt, bt, wr, br, bn1, bn2, bnr,
                          compute_dtype=jnp.float32):
    """Fold eval-mode BatchNorms and build the kron'd / bias-folded operands.

    Call ONCE and reuse across forwards (perf review: hoist the adjacency/kron
    construction out of the per-call path)."""
    def scale_shift(p):
        g, b, m, v = p
        s = g / jnp.sqrt(v + EPS)
        return s, b - m * s

    s1, h1 = scale_shift(bn1)     # tcn BN before PReLU  (scale commutes with A matmul)
    s2, h2 = scale_shift(bn2)     # tcn BN after temporal conv
    sr, hr = scale_shift(bnr)     # residual-branch BN

    wg_eff, bg_eff = s1[:, None] * wg, s1 * bg
    wr_eff, br_eff = sr[:, None] * wr, sr * br + hr
    bt_eff = s2 * bt + h2
    br_fold = br_eff + bt_eff     # tcn bias lands on the same pre-activation as residual

    eye_n = jnp.eye(N, dtype=jnp.float32)
    wg_full = jnp.kron(eye_n, wg_eff)                               # (N*C_OUT, N*C_IN)
    wr_full = jnp.kron(eye_n, wr_eff)
    w1 = jnp.concatenate([
        jnp.concatenate([wg_full, jnp.tile(bg_eff, N)[:, None]], axis=1),
        jnp.concatenate([wr_full, jnp.tile(br_fold, N)[:, None]], axis=1),
    ], axis=0).astype(jnp.float32)                                  # (64, 9)

    wt_full = jnp.stack(
        [jnp.kron(eye_n, s2[:, None] * wt[k]) for k in range(KT)], axis=0
    ).astype(compute_dtype)                                         # (KT, 32, 32)

    h1_full = jnp.tile(h1, N)[:, None].astype(jnp.float32)          # (32, 1)

    # per-sample block-diagonal adjacency (T*V, T*V); 4x smaller than kron(I_N, .)
    eye_t = jnp.eye(T, dtype=A.dtype)
    a_blk = jnp.einsum('tvw,ts->tvsw', A, eye_t).reshape(TV, TV).astype(compute_dtype)

    return w1, wt_full, h1_full, a_blk


@jax.jit
def st_gcn_forward(x, A, params, alphas):
    """x: (N, C_IN, T, V); params from prepare_st_gcn_params; alphas: (2,) PReLU."""
    w1, wt_full, h1_full, a_blk = params

    # channels+batch -> sublanes, (t, v) -> lanes; plus a ones row for the bias fold
    xf = x.reshape(N * C_IN, TV)
    x1 = jnp.concatenate([xf, jnp.ones((1, TV), xf.dtype)], axis=0)  # (9, 128)

    out_flat = pl.pallas_call(
        st_gcn_kernel,
        out_shape=jax.ShapeDtypeStruct((C_TOT, TV), jnp.float32),
        in_specs=[
            pl.BlockSpec(memory_space=pltpu.MemorySpace.VMEM),   # x1
            pl.BlockSpec(memory_space=pltpu.MemorySpace.VMEM),   # a_blk (128,128)
            pl.BlockSpec(memory_space=pltpu.MemorySpace.VMEM),   # w1 fused 1x1 weights
            pl.BlockSpec(memory_space=pltpu.MemorySpace.VMEM),   # wt_full temporal taps
            pl.BlockSpec(memory_space=pltpu.MemorySpace.VMEM),   # h1_full BN1 shift
            pl.BlockSpec(memory_space=pltpu.MemorySpace.SMEM),   # PReLU alphas
        ],
        out_specs=pl.BlockSpec(memory_space=pltpu.MemorySpace.VMEM),
    )(x1, a_blk, w1, wt_full, h1_full, alphas)

    out = out_flat.reshape(N, C_OUT, T, V)      # no transpose needed in this layout
    return out, A


def ref_forward(x, A, wg, bg, wt, bt, wr, br, bn1, bn2, bnr, alphas):
    """Pure-JAX reference of the PyTorch module (eval-mode BatchNorm)."""
    P = jax.lax.Precision.HIGHEST

    def bn(t, p):
        g, b, m, v = (q.reshape(1, -1, 1, 1) for q in p)
        return (t - m) / jnp.sqrt(v + EPS) * g + b

    def prelu(t, a):
        return jnp.where(t >= 0.0, t, a * t)

    rs = lambda p: p.reshape(1, -1, 1, 1)

    # residual: Conv2d 1x1 + BatchNorm2d
    res = jnp.einsum('oc,nctv->notv', wr, x, precision=P) + rs(br)
    res = bn(res, bnr)
    # gcn: Conv2d (1,1) then einsum with A
    y = jnp.einsum('oc,nctv->notv', wg, x, precision=P) + rs(bg)
    z = jnp.einsum('nctv,tvw->nctw', y, A, precision=P)
    # tcn: BN -> PReLU -> Conv2d (KT,1), pad (PAD,0) -> BN -> Dropout(0)
    h = prelu(bn(z, bn1), alphas[0])
    hp = jnp.pad(h, ((0, 0), (0, 0), (PAD, PAD), (0, 0)))
    u = rs(bt) + sum(
        jnp.einsum('oc,nctv->notv', wt[k], hp[:, :, k:k + T, :], precision=P)
        for k in range(KT))
    u = bn(u, bn2)
    o = u + res
    return prelu(o, alphas[1])


if __name__ == "__main__":
    key = jax.random.PRNGKey(0)
    ks = jax.random.split(key, 24)

    # inputs
    x = jax.random.normal(ks[0], (N, C_IN, T, V), jnp.float32)
    A = jax.random.normal(ks[1], (T, V, V), jnp.float32) * 0.3   # A.shape[0] == kernel_size[1] == T

    # conv parameters (tap-major temporal weight; 1x1 convs as plain matrices)
    wg = jax.random.normal(ks[2], (C_OUT, C_IN), jnp.float32) * 0.2     # gcn.conv (t_kernel_size=1)
    bg = jax.random.normal(ks[3], (C_OUT,), jnp.float32) * 0.1
    wt = jax.random.normal(ks[4], (KT, C_OUT, C_OUT), jnp.float32) * 0.1  # tcn Conv2d (KT,1)
    bt = jax.random.normal(ks[5], (C_OUT,), jnp.float32) * 0.1
    wr = jax.random.normal(ks[6], (C_OUT, C_IN), jnp.float32) * 0.2     # residual 1x1 conv
    br = jax.random.normal(ks[7], (C_OUT,), jnp.float32) * 0.1

    # BatchNorm2d (eval mode) params: gamma, beta, running_mean, running_var
    def make_bn(k0, k1, k2, k3):
        g = 1.0 + 0.1 * jax.random.normal(ks[k0], (C_OUT,), jnp.float32)
        b = 0.1 * jax.random.normal(ks[k1], (C_OUT,), jnp.float32)
        m = 0.05 * jax.random.normal(ks[k2], (C_OUT,), jnp.float32)
        v = jnp.exp(0.1 * jax.random.normal(ks[k3], (C_OUT,), jnp.float32))
        return g, b, m, v

    bn1 = make_bn(8, 9, 10, 11)     # tcn BatchNorm2d (before PReLU)
    bn2 = make_bn(12, 13, 14, 15)   # tcn BatchNorm2d (after temporal conv)
    bnr = make_bn(16, 17, 18, 19)   # residual BatchNorm2d

    alphas = jnp.array([0.25, 0.25], jnp.float32)   # nn.PReLU() default init

    # fold/prepare once (hoisted out of the per-forward path), then run the kernel
    params = prepare_st_gcn_params(A, wg, bg, wt, bt, wr, br, bn1, bn2, bnr)
    params = jax.tree_util.tree_map(jax.block_until_ready, params)

    out, A_out = st_gcn_forward(x, A, params, alphas)
    out = jax.block_until_ready(out)

    ref = ref_forward(x, A, wg, bg, wt, bt, wr, br, bn1, bn2, bnr, alphas)
    assert out.shape == (N, C_OUT, T, V)
    err = float(jnp.max(jnp.abs(out - ref)))
    assert jnp.allclose(out, ref, rtol=2e-3, atol=2e-3), err

    print("KERNEL_OK")
</pallas_src>

<mosaic_0001>
module attributes {stable_mosaic.version = 11 : i64} {
  func.func @st_gcn_kernel(%arg0: memref<9x128xf32, #tpu.memory_space<vmem>>, %arg1: memref<128x128xf32, #tpu.memory_space<vmem>>, %arg2: memref<64x9xf32, #tpu.memory_space<vmem>>, %arg3: memref<3x32x32xf32, #tpu.memory_space<vmem>>, %arg4: memref<32x1xf32, #tpu.memory_space<vmem>>, %arg5: memref<2xf32, #tpu.memory_space<smem>>, %arg6: memref<32x128xf32, #tpu.memory_space<vmem>>) attributes {dimension_semantics = [], scalar_prefetch = 0 : i64, scratch_operands = 0 : i64, tpu.core_type = #tpu.core_type<tc>} {
    %c0 = arith.constant 0 : index
    %0 = memref.load %arg5[%c0] : memref<2xf32, #tpu.memory_space<smem>>
    %c1 = arith.constant 1 : index
    %1 = memref.load %arg5[%c1] : memref<2xf32, #tpu.memory_space<smem>>
    %c0_0 = arith.constant 0 : index
    %c0_1 = arith.constant 0 : index
    %2 = vector.load %arg1[%c0_0, %c0_1] : memref<128x128xf32, #tpu.memory_space<vmem>>, vector<128x128xf32>
    %c0_2 = arith.constant 0 : index
    %c0_3 = arith.constant 0 : index
    %3 = vector.load %arg2[%c0_2, %c0_3] : memref<64x9xf32, #tpu.memory_space<vmem>>, vector<64x9xf32>
    %c0_4 = arith.constant 0 : index
    %c0_5 = arith.constant 0 : index
    %4 = vector.load %arg0[%c0_4, %c0_5] : memref<9x128xf32, #tpu.memory_space<vmem>>, vector<9x128xf32>
    %cst = arith.constant dense<0.000000e+00> : vector<64x128xf32>
    %5 = tpu.matmul %3, %4, %cst {dimension_numbers = #tpu.dot_dimension_numbers<[1], [0], [0], [1], [0, 0, 1, 1], [], []>} : vector<64x9xf32>, vector<9x128xf32>, vector<64x128xf32> -> vector<64x128xf32>
    %6 = vector.extract_strided_slice %5 {offsets = [0, 0], sizes = [32, 128], strides = [1, 1]} : vector<64x128xf32> to vector<32x128xf32>
    %7 = vector.extract_strided_slice %5 {offsets = [32, 0], sizes = [32, 128], strides = [1, 1]} : vector<64x128xf32> to vector<32x128xf32>
    %cst_6 = arith.constant dense<0.000000e+00> : vector<32x128xf32>
    %8 = tpu.matmul %6, %2, %cst_6 {dimension_numbers = #tpu.dot_dimension_numbers<[1], [0], [0], [1], [0, 0, 1, 1], [], []>} : vector<32x128xf32>, vector<128x128xf32>, vector<32x128xf32> -> vector<32x128xf32>
    %c0_7 = arith.constant 0 : index
    %c0_8 = arith.constant 0 : index
    %9 = vector.load %arg4[%c0_7, %c0_8] : memref<32x1xf32, #tpu.memory_space<vmem>>, vector<32x1xf32>
    %10 = vector.broadcast %9 : vector<32x1xf32> to vector<32x128xf32>
    %11 = arith.addf %8, %10 : vector<32x128xf32>
    %cst_9 = arith.constant 0.000000e+00 : f32
    %12 = vector.broadcast %cst_9 : f32 to vector<32x128xf32>
    %13 = arith.cmpf oge, %11, %12 : vector<32x128xf32>
    %14 = vector.broadcast %0 : f32 to vector<32x128xf32>
    %15 = arith.mulf %14, %11 : vector<32x128xf32>
    %16 = arith.select %13, %11, %15 : vector<32x128xi1>, vector<32x128xf32>
    %17 = tpu.iota {dimensions = array<i32: 1>} : vector<32x128xi32>
    %cst_10 = arith.constant 0.000000e+00 : f32
    %18 = vector.broadcast %cst_10 : f32 to vector<32x128xf32>
    %c16_i32 = arith.constant 16 : i32
    %19 = vector.broadcast %c16_i32 : i32 to vector<32x128xi32>
    %20 = arith.cmpi sge, %17, %19 : vector<32x128xi32>
    %c16_i32_11 = arith.constant 16 : i32
    %21 = tpu.dynamic_rotate %16 by %c16_i32_11 dim 1 : vector<32x128xf32>, i32 -> vector<32x128xf32>
    %cst_12 = arith.constant 0.000000e+00 : f32
    %22 = vector.broadcast %cst_12 : f32 to vector<32x128xf32>
    %23 = arith.select %20, %21, %22 : vector<32x128xi1>, vector<32x128xf32>
    %c0_13 = arith.constant 0 : index
    %c0_14 = arith.constant 0 : index
    %c0_15 = arith.constant 0 : index
    %24 = vector.load %arg3[%c0_13, %c0_14, %c0_15] : memref<3x32x32xf32, #tpu.memory_space<vmem>>, vector<1x32x32xf32>
    %25 = vector.shape_cast %24 : vector<1x32x32xf32> to vector<32x32xf32>
    %cst_16 = arith.constant dense<0.000000e+00> : vector<32x128xf32>
    %26 = tpu.matmul %25, %23, %cst_16 {dimension_numbers = #tpu.dot_dimension_numbers<[1], [0], [0], [1], [0, 0, 1, 1], [], []>} : vector<32x32xf32>, vector<32x128xf32>, vector<32x128xf32> -> vector<32x128xf32>
    %27 = arith.addf %18, %26 : vector<32x128xf32>
    %c1_17 = arith.constant 1 : index
    %c0_18 = arith.constant 0 : index
    %c0_19 = arith.constant 0 : index
    %28 = vector.load %arg3[%c1_17, %c0_18, %c0_19] : memref<3x32x32xf32, #tpu.memory_space<vmem>>, vector<1x32x32xf32>
    %29 = vector.shape_cast %28 : vector<1x32x32xf32> to vector<32x32xf32>
    %cst_20 = arith.constant dense<0.000000e+00> : vector<32x128xf32>
    %30 = tpu.matmul %29, %16, %cst_20 {dimension_numbers = #tpu.dot_dimension_numbers<[1], [0], [0], [1], [0, 0, 1, 1], [], []>} : vector<32x32xf32>, vector<32x128xf32>, vector<32x128xf32> -> vector<32x128xf32>
    %31 = arith.addf %27, %30 : vector<32x128xf32>
    %c112_i32 = arith.constant 112 : i32
    %32 = vector.broadcast %c112_i32 : i32 to vector<32x128xi32>
    %33 = arith.cmpi slt, %17, %32 : vector<32x128xi32>
    %c112_i32_21 = arith.constant 112 : i32
    %34 = tpu.dynamic_rotate %16 by %c112_i32_21 dim 1 : vector<32x128xf32>, i32 -> vector<32x128xf32>
    %cst_22 = arith.constant 0.000000e+00 : f32
    %35 = vector.broadcast %cst_22 : f32 to vector<32x128xf32>
    %36 = arith.select %33, %34, %35 : vector<32x128xi1>, vector<32x128xf32>
    %c2 = arith.constant 2 : index
    %c0_23 = arith.constant 0 : index
    %c0_24 = arith.constant 0 : index
    %37 = vector.load %arg3[%c2, %c0_23, %c0_24] : memref<3x32x32xf32, #tpu.memory_space<vmem>>, vector<1x32x32xf32>
    %38 = vector.shape_cast %37 : vector<1x32x32xf32> to vector<32x32xf32>
    %cst_25 = arith.constant dense<0.000000e+00> : vector<32x128xf32>
    %39 = tpu.matmul %38, %36, %cst_25 {dimension_numbers = #tpu.dot_dimension_numbers<[1], [0], [0], [1], [0, 0, 1, 1], [], []>} : vector<32x32xf32>, vector<32x128xf32>, vector<32x128xf32> -> vector<32x128xf32>
    %40 = arith.addf %31, %39 : vector<32x128xf32>
    %41 = arith.addf %40, %7 : vector<32x128xf32>
    %cst_26 = arith.constant 0.000000e+00 : f32
    %42 = vector.broadcast %cst_26 : f32 to vector<32x128xf32>
    %43 = arith.cmpf oge, %41, %42 : vector<32x128xf32>
    %44 = vector.broadcast %1 : f32 to vector<32x128xf32>
    %45 = arith.mulf %44, %41 : vector<32x128xf32>
    %46 = arith.select %43, %41, %45 : vector<32x128xi1>, vector<32x128xf32>
    %c0_27 = arith.constant 0 : index
    %c0_28 = arith.constant 0 : index
    %47 = vector.load %arg6[%c0_27, %c0_28] : memref<32x128xf32, #tpu.memory_space<vmem>>, vector<32x128xf32>
    tpu.vector_store %arg6[%c0_27, %c0_28], %46 {strides = array<i32>} : memref<32x128xf32, #tpu.memory_space<vmem>>, vector<32x128xf32>,
    return
  }
}

</mosaic_0001>

<bundles_post_ra>
// kernel: st_gcn_forward.1
= control target key start
LH: loop header
LB: loop body
LE: loop exit
PB: predicated region body
PF: predicated region fallthrough
CT: control target
= control target key end

     0   :  { %11 = vsyncpa [#allocation3], 0  ;;  %s1110_s0 = inlined_call_operand.vmem [shape: f32[9,128], index: 0, kind: input, shape index: {}]   ;;  %s1111_s1 = inlined_call_operand.vmem [shape: f32[128,128], index: 1, kind: input, shape index: {}]   ;;  %s1112_s2 = inlined_call_operand.vmem [shape: f32[64,9], index: 2, kind: input, shape index: {}]   ;;  %s1113_s3 = inlined_call_operand.hbm [shape: f32[3,32,32], index: 3, kind: input, shape index: {}]   ;;  %s1114_s4 = inlined_call_operand.vmem [shape: f32[32,1], index: 4, kind: input, shape index: {}]   ;;  %s1115_s5 = inlined_call_operand.vmem [shape: f32[2], index: 5, kind: input, shape index: {}]   ;;  %s1116_s6 = inlined_call_operand.vmem [shape: f32[32,128], index: 6, kind: output, shape index: {}]  }
   0x1   :  { %12 = vsyncpa [#allocation4], 0  ;;  %s924_s21 = smov [#allocation2]   ;;  %s39_s25 = sshll.u32 %s1115_s5, 4  ;;  %s40_s25 = int_to_ptr.vmem [resolvable:$true] %s39_s25 }
   0x2   :  { %s24_s22 = sshll.u32 %s924_s21, 4  ;;  %s25_s22 = int_to_ptr.vmem [resolvable:$true] %s24_s22 }
   0x3   :  { %s896_s26 = scalar_lea.vmem %s25_s22, 1536  ;;  %p901_p1 = scmp.lt.s32.totalorder %s25_s22, %s25_s22 }
   0x4   :  { %p897_p0 = scmp.ne.s32.totalorder %s25_s22, %s896_s26  ;;  %p902_p2 = scmp.lt.s32.totalorder %s896_s26, %s896_s26 }
   0x6   :  { %p903_p3 = por %p902_p2, %p901_p1 }
   0x8   :  { %p904_p4 = pnand %p903_p3, %p897_p0 }
   0xa   :  { %907 = shalt.err (!%p904_p4)
}
   0xb   :  { %s925_s27 = smov 128   ;;  %s926_s28 = smov 8  }
   0xc   :  { %30 = dma.hbm_to_vmem [thread:$0]  %s1113_s3, 1536, %s25_s22, [#allocation3], %s925_s27, %s925_s27, %s926_s28  }
   0xd   :  { %s908_s7 = scalar_lea.vmem %s40_s25, 16  ;;  %p913_p6 = scmp.lt.s32.totalorder %s40_s25, %s40_s25 }
   0xe   :  { %p909_p5 = scmp.ne.s32.totalorder %s40_s25, %s908_s7  ;;  %p914_p7 = scmp.lt.s32.totalorder %s908_s7, %s908_s7 }
  0x10   :  { %p915_p8 = por %p914_p7, %p913_p6 }
  0x12   :  { %p916_p9 = pnand %p915_p8, %p909_p5 }
  0x14   :  { %919 = shalt.err (!%p916_p9)
}
  0x15   :  { %s927_s5 = smov [#allocation5]  }
  0x16   :  { %42 = dma.vmem_to_smem %s40_s25, 16, %s927_s5, [#allocation4]  }
  0x17   :  { %920 = dma.done.wait [#allocation3], 1536  }
  0x18   :  { %921 = vsyncadd [#allocation3], 4294965760 }
  0x19   :  { %922 = dma.done.wait [#allocation4], 16  }
  0x1a   :  { %923 = vsyncadd [#allocation4], 4294967280 }
  0x1b   :  { %49 = sfence }
  0x1c   :  { %v77_v0 = vld [vmem:[%s1110_s0 + $0x8] sm:$0x1]  ;;  %vm103_vm0 = vcmask 1040384   ;;  %v76_v1 = vld [vmem:[%s1110_s0] sm:$0xff]  ;;  %vm78_vm1 = vcmask 72704   ;;  %v67_v4 = vld [vmem:[%s1111_s1 + $0x78] sm:$0xff]  ;;  %v334_v61 = vlaneseq }
  0x1d   :  { %v68_v2 = vld [vmem:[%s1112_s2] sm:$0xff]  ;;  %783 = vmatprep.subr.msk.mxu0 %vm103_vm0, %v77_v0  ;;  %v69_v3 = vld [vmem:[%s1112_s2 + $0x8] sm:$0xff]  ;;  %v66_v5 = vld [vmem:[%s1111_s1 + $0x70] sm:$0xff]  ;;  %799 = vmatprep.subr.mxu1 %v67_v4  ;;  %v928_v24 = vmov 0   ;;  %vm358_vm2 = vcmask 261120   ;;  %s50_s11 = sld [smem:[#allocation5]] }
  0x1e   :  { %787 = vmatprep.mubr.msk.f32.mxu0 %vm78_vm1, %v68_v2  ;;  %784 = vmatpush3.msk.msra.mxu0 %vm103_vm0, %v77_v0  ;;  %v70_v6 = vld [vmem:[%s1112_s2 + $0x10] sm:$0xff]  ;;  %v65_v7 = vld [vmem:[%s1111_s1 + $0x68] sm:$0xff]  ;;  %v71_v8 = vld [vmem:[%s1112_s2 + $0x18] sm:$0xff]  ;;  %s930_s12 = smov 112   ;;  %v335_v62 = vand.u32 127, %v334_v61  ;;  %s699_s13 = sld [smem:[#allocation5 + $0x1]] }
  0x1f   :  { %785 = vmatprep.subr.mxu0 %v76_v1  ;;  %800 = vmatpush3.msra.mxu1 %v67_v4  ;;  %v64_v9 = vld [vmem:[%s1111_s1 + $0x60] sm:$0xff]  ;;  %v63_v10 = vld [vmem:[%s1111_s1 + $0x58] sm:$0xff]  ;;  %v62_v11 = vld [vmem:[%s1111_s1 + $0x50] sm:$0xff] }
  0x20   :  { %786 = vmatpush3.msra.mxu0 %v76_v1  ;;  %801 = vmatprep.subr.mxu1 %v66_v5  ;;  %v61_v12 = vld [vmem:[%s1111_s1 + $0x48] sm:$0xff]  ;;  %v60_v13 = vld [vmem:[%s1111_s1 + $0x40] sm:$0xff]  ;;  %v59_v14 = vld [vmem:[%s1111_s1 + $0x38] sm:$0xff]  ;;  %vm336_vm7 = vcmp.ge.s32.totalorder %v335_v62, 16  ;;  %vm553_vm8 = vcmp.lt.s32.totalorder %v335_v62, 112 }
  0x21   :  { %788 = vmatmul.mubr.msk.f32.vlgmr.msra.gmra.mxu0 %vm78_vm1, %v69_v3  ;;  %802 = vmatpush3.msra.mxu1 %v66_v5  ;;  %v58_v15 = vld [vmem:[%s1111_s1 + $0x30] sm:$0xff]  ;;  %v57_v16 = vld [vmem:[%s1111_s1 + $0x28] sm:$0xff]  ;;  %v56_v17 = vld [vmem:[%s1111_s1 + $0x20] sm:$0xff] }
  0x22   :  { %790 = vmatprep.mubr.msk.f32.mxu0 %vm78_vm1, %v70_v6  ;;  %803 = vmatprep.subr.mxu1 %v65_v7  ;;  %v55_v18 = vld [vmem:[%s1111_s1 + $0x18] sm:$0xff]  ;;  %v54_v19 = vld [vmem:[%s1111_s1 + $0x10] sm:$0xff]  ;;  %v53_v20 = vld [vmem:[%s1111_s1 + $0x8] sm:$0xff] }
  0x23   :  { %804 = vmatpush3.msra.mxu1 %v65_v7  ;;  %v52_v21 = vld [vmem:[%s1111_s1] sm:$0xff]  ;;  %v215_v22 = vld [vmem:[%s1114_s4 + $0x18] sm:$0xff]  ;;  %v213_v23 = vld [vmem:[%s1114_s4 + $0x8] sm:$0xff]  ;;  %887 = vset.pattern.permute.xlu1 %v928_v24  ;;  %v325_v44 = vstv %s50_s11 }
  0x24   :  { %805 = vmatprep.subr.mxu1 %v64_v9  ;;  %886 = vset.pattern.permute.xlu0 %v928_v24  ;;  %v214_v25 = vld [vmem:[%s1114_s4 + $0x10] sm:$0xff]  ;;  %v212_v26 = vld [vmem:[%s1114_s4] sm:$0xff]  ;;  %v73_v32 = vld [vmem:[%s1112_s2 + $0x28] sm:$0xff] }
  0x25   :  { %791 = vmatmul.mubr.msk.f32.gmra.mxu0 %vm78_vm1, %v71_v8  ;;  %806 = vmatpush3.msra.mxu1 %v64_v9  ;;  %v72_v31 = vld [vmem:[%s1112_s2 + $0x20] sm:$0xff]  ;;  %v74_v33 = vld [vmem:[%s1112_s2 + $0x30] sm:$0xff]  ;;  %v75_v34 = vld [vmem:[%s1112_s2 + $0x38] sm:$0xff]  ;;  %s929_s2 = smov 16  }
  0x26   :  { %807 = vmatprep.subr.mxu1 %v63_v10  ;;  %233 = vperm.xlu0 %886, %v215_v22   ;;  %v354_v35 = vld [vmem:[#allocation2 + $0x20] sm:$0xff]  ;;  %v355_v57 = vld [vmem:[#allocation2 + $0x28] sm:$0xff]  ;;  %v356_v58 = vld [vmem:[#allocation2 + $0x30] sm:$0xff] }
  0x27   :  { %808 = vmatpush3.msra.mxu1 %v63_v10  ;;  %223 = vperm.xlu1 %887, %v213_v23   ;;  %v357_v59 = vld [vmem:[#allocation2 + $0x38] sm:$0xff]  ;;  %v349_v60 = vld [vmem:[#allocation2] sm:$0xff]  ;;  %v350_v3 = vld [vmem:[#allocation2 + $0x8] sm:$0xff] }
  0x28   :  { %809 = vmatprep.subr.mxu1 %v62_v11  ;;  %793 = vmatprep.mubr.msk.f32.mxu0 %vm78_vm1, %v72_v31  ;;  %v351_v4 = vld [vmem:[#allocation2 + $0x10] sm:$0xff]  ;;  %v352_v7 = vld [vmem:[#allocation2 + $0x18] sm:$0xff]  ;;  %v567_v8 = vld [vmem:[#allocation2 + $0x40] sm:$0xff] }
  0x29   :  { %810 = vmatpush3.msra.mxu1 %v62_v11  ;;  %794 = vmatmul.mubr.msk.f32.gmra.mxu0 %vm78_vm1, %v73_v32  ;;  %v568_v11 = vld [vmem:[#allocation2 + $0x48] sm:$0xff] }
  0x2a   :  { %811 = vmatprep.subr.mxu1 %v61_v12  ;;  %228 = vperm.xlu0 %886, %v214_v25  }
  0x2b   :  { %812 = vmatpush3.msra.mxu1 %v61_v12  ;;  %218 = vperm.xlu1 %887, %v212_v26   ;;  %v569_v12 = vld [vmem:[#allocation2 + $0x50] sm:$0xff] }
  0x2c   :  { %813 = vmatprep.subr.mxu1 %v60_v13  ;;  %796 = vmatprep.mubr.msk.f32.mxu0 %vm78_vm1, %v74_v33 }
  0x2d   :  { %814 = vmatpush3.msra.mxu1 %v60_v13  ;;  %797 = vmatmul.mubr.msk.f32.gmra.mxu0 %vm78_vm1, %v75_v34  ;;  %v570_v13 = vld [vmem:[#allocation2 + $0x58] sm:$0xff] }
  0x2e   :  { %815 = vmatprep.subr.mxu1 %v59_v14  ;;  %845 = vmatprep.mubr.msk.f32.mxu0 %vm358_vm2, %v354_v35 }
  0x2f   :  { %816 = vmatpush3.msra.mxu1 %v59_v14 }
  0x30   :  { %817 = vmatprep.subr.mxu1 %v58_v15 }
  0x31   :  { %818 = vmatpush3.msra.mxu1 %v58_v15 }
  0x32   :  { %819 = vmatprep.subr.mxu1 %v57_v16 }
  0x33   :  { %820 = vmatpush3.msra.mxu1 %v57_v16 }
  0x34   :  { %821 = vmatprep.subr.mxu1 %v56_v17 }
  0x35   :  { %822 = vmatpush3.msra.mxu1 %v56_v17 }
  0x36   :  { %823 = vmatprep.subr.mxu1 %v55_v18 }
  0x37   :  { %824 = vmatpush3.msra.mxu1 %v55_v18 }
  0x38   :  { %825 = vmatprep.subr.mxu1 %v54_v19 }
  0x39   :  { %826 = vmatpush3.msra.mxu1 %v54_v19 }
  0x3a   :  { %827 = vmatprep.subr.mxu1 %v53_v20 }
  0x3b   :  { %828 = vmatpush3.msra.mxu1 %v53_v20 }
  0x3c   :  { %829 = vmatprep.subr.mxu1 %v52_v21 }
  0x3d   :  { %830 = vmatpush3.msra.mxu1 %v52_v21 }
  0xa1   :  { %v234_v37 = vpop.permute.xlu0 %233 }
  0xa2   :  { %v224_v36 = vpop.permute.xlu1 %223 }
  0xa5   :  { %v229_v45 = vpop.permute.xlu0 %228 }
  0xa6   :  { %v219_v40 = vpop.permute.xlu1 %218 }
  0xe1   :  { %v789_v27 = vpop.f32.mrf.mxu0 }
  0xe3   :  { %v173_v28 = vpop.f32.mrf.mxu0 }
  0xe4   :  { %831 = vmatprep.mubr.f32.mxu1 %v173_v28 }
  0xe5   :  { %v792_v29 = vpop.f32.mrf.mxu0  ;;  %832 = vmatmul.mubr.f32.vlgmr.msra.gmra.mxu1 %v789_v27 }
  0xe7   :  { %v183_v30 = vpop.f32.mrf.mxu0 }
  0xe8   :  { %834 = vmatprep.mubr.f32.mxu1 %v183_v30  ;;  %v680_v30 = vstv %s699_s13 }
  0xe9   :  { %835 = vmatmul.mubr.f32.gmra.mxu1 %v792_v29  ;;  %v795_v14 = vpop.f32.mrf.mxu0 }
  0xeb   :  { %v193_v15 = vpop.f32.mrf.mxu0 }
  0xed   :  { %v798_v16 = vpop.f32.mrf.mxu0 }
  0xef   :  { %v203_v17 = vpop.f32.mrf.mxu0 }
 0x1a5   :  { %v833_v38 = vpop.f32.mrf.mxu1 }
 0x1a6   :  { %v308_v42 = vadd.f32 %v833_v38, %v224_v36 }
 0x1a7   :  { %v302_v39 = vpop.f32.mrf.mxu1 }
 0x1a8   :  { %v303_v47 = vadd.f32 %v302_v39, %v219_v40  ;;  %v327_v50 = vmul.f32 %v325_v44, %v308_v42  ;;  %vm322_vm5 = vcmp.ge.f32.partialorder %v308_v42, 0.0 }
 0x1a9   :  { %v836_v41 = vpop.f32.mrf.mxu1 }
 0x1aa   :  { %v318_v43 = vadd.f32 %v836_v41, %v234_v37  ;;  %v326_v53 = vmul.f32 %v325_v44, %v303_v47  ;;  %vm321_vm6 = vcmp.ge.f32.partialorder %v303_v47, 0.0  ;;  %v331_v55 = vsel %vm322_vm5, %v308_v42, %v327_v50 }
 0x1ab   :  { %v312_v46 = vpop.f32.mrf.mxu1 }
 0x1ac   :  { %vm324_vm3 = vcmp.ge.f32.partialorder %v318_v43, 0.0  ;;  %v329_v48 = vmul.f32 %v325_v44, %v318_v43  ;;  %v313_v49 = vadd.f32 %v312_v46, %v229_v45  ;;  %v330_v56 = vsel %vm321_vm6, %v303_v47, %v326_v53 }
 0x1ae   :  { %vm323_vm4 = vcmp.ge.f32.partialorder %v313_v49, 0.0  ;;  %v328_v51 = vmul.f32 %v325_v44, %v313_v49  ;;  %v333_v52 = vsel %vm324_vm3, %v318_v43, %v329_v48 }
 0x1af   :  { %343 = vrot.lane.b32.xlu0 %v333_v52, %s929_s2  ;;  %837 = vmatprep.subr.mxu0 %v333_v52 }
 0x1b0   :  { %838 = vmatpush3.msra.mxu0 %v333_v52  ;;  %v332_v54 = vsel %vm323_vm4, %v313_v49, %v328_v51 }
 0x1b1   :  { %341 = vrot.lane.b32.xlu1 %v332_v54, %s929_s2  ;;  %839 = vmatprep.subr.mxu0 %v332_v54 }
 0x1b2   :  { %840 = vmatpush3.msra.mxu0 %v332_v54 }
 0x1b3   :  { %339 = vrot.lane.b32.xlu0 %v331_v55, %s929_s2  ;;  %841 = vmatprep.subr.mxu0 %v331_v55 }
 0x1b4   :  { %842 = vmatpush3.msra.mxu0 %v331_v55 }
 0x1b5   :  { %337 = vrot.lane.b32.xlu1 %v330_v56, %s929_s2  ;;  %843 = vmatprep.subr.mxu0 %v330_v56 }
 0x1b6   :  { %844 = vmatpush3.msra.mxu0 %v330_v56 }
 0x1b7   :  { %560 = vrot.lane.b32.xlu0 %v333_v52, %s930_s12  ;;  %846 = vmatmul.mubr.msk.f32.vlgmr.msra.gmra.mxu0 %vm358_vm2, %v355_v57 }
 0x1b8   :  { %848 = vmatprep.mubr.msk.f32.mxu0 %vm358_vm2, %v356_v58 }
 0x1b9   :  { %558 = vrot.lane.b32.xlu1 %v332_v54, %s930_s12 }
 0x1bb   :  { %556 = vrot.lane.b32.xlu0 %v331_v55, %s930_s12  ;;  %849 = vmatmul.mubr.msk.f32.gmra.mxu0 %vm358_vm2, %v357_v59 }
 0x1bc   :  { %859 = vmatprep.mubr.msk.f32.mxu0 %vm358_vm2, %v349_v60 }
 0x1bd   :  { %554 = vrot.lane.b32.xlu1 %v330_v56, %s930_s12 }
 0x221   :  { %v344_v63 = vpop.permute.xlu0 %343 }
 0x222   :  { %851 = vmatprep.subr.msk.mxu0 %vm336_vm7, %v344_v63 }
 0x223   :  { %v342_v0 = vpop.permute.xlu1 %341  ;;  %852 = vmatpush3.msk.msra.mxu0 %vm336_vm7, %v344_v63 }
 0x224   :  { %853 = vmatprep.subr.msk.mxu0 %vm336_vm7, %v342_v0 }
 0x225   :  { %v340_v1 = vpop.permute.xlu0 %339  ;;  %854 = vmatpush3.msk.msra.mxu0 %vm336_vm7, %v342_v0 }
 0x226   :  { %855 = vmatprep.subr.msk.mxu0 %vm336_vm7, %v340_v1 }
 0x227   :  { %v338_v2 = vpop.permute.xlu1 %337  ;;  %856 = vmatpush3.msk.msra.mxu0 %vm336_vm7, %v340_v1 }
 0x228   :  { %857 = vmatprep.subr.msk.mxu0 %vm336_vm7, %v338_v2 }
 0x229   :  { %v561_v5 = vpop.permute.xlu0 %560  ;;  %858 = vmatpush3.msk.msra.mxu0 %vm336_vm7, %v338_v2 }
 0x22a   :  { %860 = vmatmul.mubr.msk.f32.vlgmr.msra.gmra.mxu0 %vm358_vm2, %v350_v3  ;;  %865 = vmatprep.subr.msk.mxu0 %vm553_vm8, %v561_v5 }
 0x22b   :  { %v559_v6 = vpop.permute.xlu1 %558  ;;  %866 = vmatpush3.msk.msra.mxu0 %vm553_vm8, %v561_v5  ;;  %862 = vmatprep.mubr.msk.f32.mxu0 %vm358_vm2, %v351_v4 }
 0x22c   :  { %867 = vmatprep.subr.msk.mxu0 %vm553_vm8, %v559_v6 }
 0x22d   :  { %v557_v9 = vpop.permute.xlu0 %556  ;;  %868 = vmatpush3.msk.msra.mxu0 %vm553_vm8, %v559_v6 }
 0x22e   :  { %863 = vmatmul.mubr.msk.f32.gmra.mxu0 %vm358_vm2, %v352_v7  ;;  %869 = vmatprep.subr.msk.mxu0 %vm553_vm8, %v557_v9 }
 0x22f   :  { %v555_v10 = vpop.permute.xlu1 %554  ;;  %870 = vmatpush3.msk.msra.mxu0 %vm553_vm8, %v557_v9  ;;  %873 = vmatprep.mubr.msk.f32.mxu0 %vm358_vm2, %v567_v8 }
 0x230   :  { %871 = vmatprep.subr.msk.mxu0 %vm553_vm8, %v555_v10 }
 0x231   :  { %872 = vmatpush3.msk.msra.mxu0 %vm553_vm8, %v555_v10 }
 0x232   :  { %874 = vmatmul.mubr.msk.f32.vlgmr.msra.gmra.mxu0 %vm358_vm2, %v568_v11 }
 0x233   :  { %876 = vmatprep.mubr.msk.f32.mxu0 %vm358_vm2, %v569_v12 }
 0x236   :  { %877 = vmatmul.mubr.msk.f32.gmra.mxu0 %vm358_vm2, %v570_v13 }
 0x277   :  { %v847_v18 = vpop.f32.mrf.mxu0 }
 0x279   :  { %v437_v19 = vpop.f32.mrf.mxu0 }
 0x27b   :  { %v850_v20 = vpop.f32.mrf.mxu0 }
 0x27d   :  { %v447_v21 = vpop.f32.mrf.mxu0 }
 0x2ea   :  { %v861_v22 = vpop.f32.mrf.mxu0 }
 0x2eb   :  { %v540_v26 = vadd.f32 %v861_v22, %v847_v18 }
 0x2ec   :  { %v534_v23 = vpop.f32.mrf.mxu0 }
 0x2ed   :  { %v535_v28 = vadd.f32 %v534_v23, %v437_v19 }
 0x2ee   :  { %v864_v24 = vpop.f32.mrf.mxu0 }
 0x2ef   :  { %v550_v32 = vadd.f32 %v864_v24, %v850_v20 }
 0x2f0   :  { %v544_v25 = vpop.f32.mrf.mxu0 }
 0x2f1   :  { %v545_v39 = vadd.f32 %v544_v25, %v447_v21 }
 0x2f2   :  { %v875_v27 = vpop.f32.mrf.mxu0 }
 0x2f3   :  { %v669_v29 = vadd.f32 %v875_v27, %v540_v26 }
 0x2f4   :  { %v649_v31 = vpop.f32.mrf.mxu0 }
 0x2f5   :  { %v673_v33 = vadd.f32 %v795_v14, %v669_v29  ;;  %v668_v34 = vadd.f32 %v649_v31, %v535_v28 }
 0x2f6   :  { %v878_v35 = vpop.f32.mrf.mxu0 }
 0x2f7   :  { %vm677_vm9 = vcmp.ge.f32.partialorder %v673_v33, 0.0  ;;  %v682_v36 = vmul.f32 %v680_v30, %v673_v33  ;;  %v672_v37 = vadd.f32 %v668_v34, %v193_v15  ;;  %v671_v38 = vadd.f32 %v878_v35, %v550_v32 }
 0x2f8   :  { %v659_v40 = vpop.f32.mrf.mxu0 }
 0x2f9   :  { %v686_v41 = vsel %vm677_vm9, %v673_v33, %v682_v36  ;;  %vm676_vm10 = vcmp.ge.f32.partialorder %v672_v37, 0.0  ;;  %v681_v42 = vmul.f32 %v680_v30, %v672_v37  ;;  %v675_v43 = vadd.f32 %v798_v16, %v671_v38 }
 0x2fa   :  { %690 = vst [vmem:[%s1116_s6 + $0x8] sm:$0xff] %v686_v41  ;;  %v670_v44 = vadd.f32 %v659_v40, %v545_v39 }
 0x2fb   :  { %v685_v45 = vsel %vm676_vm10, %v672_v37, %v681_v42  ;;  %vm679_vm11 = vcmp.ge.f32.partialorder %v675_v43, 0.0  ;;  %v684_v46 = vmul.f32 %v680_v30, %v675_v43 }
 0x2fc   :  { %689 = vst [vmem:[%s1116_s6] sm:$0xff] %v685_v45  ;;  %v674_v47 = vadd.f32 %v670_v44, %v203_v17 }
 0x2fd   :  { %v688_v48 = vsel %vm679_vm11, %v675_v43, %v684_v46 }
 0x2fe   :  { %692 = vst [vmem:[%s1116_s6 + $0x18] sm:$0xff] %v688_v48  ;;  %vm678_vm12 = vcmp.ge.f32.partialorder %v674_v47, 0.0  ;;  %v683_v49 = vmul.f32 %v680_v30, %v674_v47 }
 0x300   :  { %v687_v50 = vsel %vm678_vm12, %v674_v47, %v683_v49 }
 0x301   :  { %691 = vst [vmem:[%s1116_s6 + $0x10] sm:$0xff] %v687_v50 }
 0x302   :  { %697 = vsyncpa [#allocation3], 1 }
 0x303   :  { %698 = vsyncpa [#allocation4], 1 }

</bundles_post_ra>
